<compile_context>
chip_gen: v7x
topology: tpu7x:2x2x1
jax: 0.10.0
libtpu: 0.0.40
codegen_flags: <defaults>
</compile_context>

<pallas_src>
import math

import jax
import jax.numpy as jnp
from jax.experimental import pallas as pl
from jax.experimental.pallas import tpu as pltpu

MAX_BONDS = 6


# ----------------------------------------------------------------------------
# Shared MLP math (mirrors torch MLP: two residual FFN blocks + projection).
# Weights are bf16 MXU operands; activations cast at the dot; accumulation and
# all elementwise work (bias, ReLU, residual) stay f32.
# ----------------------------------------------------------------------------
def _mlp_apply(x, w1, b1, w2, b2, w3, b3, w4, b4, w5, b5):
    def dot(a, w):
        return jnp.dot(a.astype(jnp.bfloat16), w,
                       preferred_element_type=jnp.float32)

    h = jnp.maximum(dot(x, w1) + b1, 0.0)
    x = x + dot(h, w2) + b2
    h = jnp.maximum(dot(x, w3) + b3, 0.0)
    x = x + dot(h, w4) + b4
    return dot(x, w5) + b5


def _mlp_args(p):
    return [p["w1"], p["b1"], p["w2"], p["b2"], p["w3"], p["b3"],
            p["w4"], p["b4"], p["w5"], p["b5"]]


# ----------------------------------------------------------------------------
# Kernel: per grid step, bb molecules -> residual MLP on a fused [bb*L, D]
# slab, bond message passing via batched MXU matmul, residual add.
# ----------------------------------------------------------------------------
def _make_kernel(bb, L, D):
    def kernel(emb_ref, adj_ref, *rest):
        m_refs, o_ref = rest[:-1], rest[-1]
        e = emb_ref[...]                                   # [bb, L, D] f32
        msg = _mlp_apply(e.reshape(bb * L, D),
                         *(r[...] for r in m_refs))        # [bb*L, D] f32
        # out_b[k, d] = sum_l adj_b[k, l] * msg_b[l, d]  (== 'lbd,bkl->kbd')
        passed = jnp.einsum('bkl,bld->bkd', adj_ref[...],
                            msg.astype(jnp.bfloat16).reshape(bb, L, D),
                            preferred_element_type=jnp.float32)
        o_ref[...] = (e + passed).astype(o_ref.dtype)
    return kernel


# ----------------------------------------------------------------------------
# Tile / VMEM sizing (chip-aware)
# ----------------------------------------------------------------------------
def _vmem_limit_bytes():
    cap = 64 * 1024 * 1024                     # conservative fallback (v7x-sized)
    try:
        cap = int(pltpu.get_tpu_info().vmem_capacity_bytes)
    except Exception:
        pass
    # ~48 MiB on v7x (64 MiB physical per TC), ~96 MiB on v5e/v6e (128 MiB).
    return max(32 * 1024 * 1024, min(100 * 1024 * 1024, (cap * 3) // 4))


def _choose_bb(B, L, D, vmem_limit):
    # Resident weights (bf16): 17*D^2 elems; biases (f32): 11*D elems.
    weight_bytes = 17 * D * D * 2 + 11 * D * 4
    budget = (vmem_limit * 3) // 5 - weight_bytes      # leave compiler headroom

    def step_bytes(bb):
        io = bb * L * (2 * D * 4 + L * 2)              # emb + out (f32), adj (bf16)
        act = bb * L * (4 * D + D) * 4                 # MLP intermediates (f32)
        return 2 * io + act                            # i/o blocks double-buffered

    bb = max(1, min(B, pl.cdiv(512, max(L, 1))))       # target >= ~512 MXU rows
    while bb > 1 and step_bytes(bb) > budget:
        bb -= 1
    while bb > 1 and pl.cdiv(B, bb) < 2:               # keep >= 2 grid steps
        bb -= 1
    return bb


def _resident_spec(x):
    nd = x.ndim
    idx = lambda g: (0,) * nd
    try:
        # Constant-index blocks stay VMEM-resident; single-buffer them.
        return pl.BlockSpec(x.shape, idx, pipeline_mode=pl.Buffered(1))
    except TypeError:
        return pl.BlockSpec(x.shape, idx)


# ----------------------------------------------------------------------------
# Pallas wrapper: fused residual MLP + bond message passing + residual.
# ----------------------------------------------------------------------------
def pallas_atom_encoder_core(emb, adj, mlp_p):
    """emb: [B, L, D] f32 (all additive terms, incl. time, pre-summed)
       adj: [B, L, L] bf16 bond adjacency, zeroed diagonal
       returns: [B, L, D] f32 (batch-major; transpose only at the module edge)."""
    B, L, D = emb.shape
    vmem_limit = _vmem_limit_bytes()
    bb = _choose_bb(B, L, D, vmem_limit)

    B_pad = pl.cdiv(B, bb) * bb
    if B_pad != B:
        emb = jnp.pad(emb, ((0, B_pad - B), (0, 0), (0, 0)))
        adj = jnp.pad(adj, ((0, B_pad - B), (0, 0), (0, 0)))

    m_args = _mlp_args(mlp_p)
    in_specs = [pl.BlockSpec((bb, L, D), lambda g: (g, 0, 0)),
                pl.BlockSpec((bb, L, L), lambda g: (g, 0, 0))]
    in_specs += [_resident_spec(a) for a in m_args]

    out = pl.pallas_call(
        _make_kernel(bb, L, D),
        out_shape=jax.ShapeDtypeStruct((B_pad, L, D), jnp.float32),
        grid_spec=pltpu.PrefetchScalarGridSpec(
            num_scalar_prefetch=0,
            grid=(B_pad // bb,),
            in_specs=in_specs,
            out_specs=pl.BlockSpec((bb, L, D), lambda g: (g, 0, 0)),
        ),
        compiler_params=pltpu.CompilerParams(
            dimension_semantics=("parallel",),
            vmem_limit_bytes=vmem_limit,
        ),
    )(emb, adj, *m_args)
    return out[:B] if B_pad != B else out


# ----------------------------------------------------------------------------
# Deterministic parameter init (matches the torch module's shapes).
# MXU weights are stored bf16 once here (no per-forward-call cast).
# ----------------------------------------------------------------------------
def _init_linear(key, fan_in, fan_out):
    bound = 1.0 / math.sqrt(fan_in)
    kw, kb = jax.random.split(key)
    w = jax.random.uniform(kw, (fan_in, fan_out), jnp.float32, -bound, bound)
    b = jax.random.uniform(kb, (1, fan_out), jnp.float32, -bound, bound)
    return w.astype(jnp.bfloat16), b


def init_mlp_params(key, dim):
    keys = jax.random.split(key, 5)
    w1, b1 = _init_linear(keys[0], dim, 4 * dim)
    w2, b2 = _init_linear(keys[1], 4 * dim, dim)
    w3, b3 = _init_linear(keys[2], dim, 4 * dim)
    w4, b4 = _init_linear(keys[3], 4 * dim, dim)
    w5, b5 = _init_linear(keys[4], dim, dim)
    return dict(w1=w1, b1=b1, w2=w2, b2=b2, w3=w3, b3=b3, w4=w4, b4=b4,
                w5=w5, b5=b5)


def make_positional_encoding(max_len, dim):
    position = jnp.arange(max_len, dtype=jnp.float32)[:, None]
    div_term = jnp.exp(jnp.arange(0, dim, 2, dtype=jnp.float32)
                       * (-math.log(10000.0) / dim))
    args = position * div_term
    pe = jnp.zeros((max_len, dim), jnp.float32)
    pe = pe.at[:, 0::2].set(jnp.sin(args))
    pe = pe.at[:, 1::2].set(jnp.cos(args))
    return pe  # [max_len, dim]


def init_atom_encoder_params(key, ntoken, dim, max_len=192):
    ks = jax.random.split(key, 7)
    return dict(
        element_embedding=jax.random.normal(ks[0], (ntoken, dim), jnp.float32),
        charge_embedding=jax.random.normal(ks[1], (13, dim), jnp.float32),
        aroma_embedding=jax.random.normal(ks[2], (2, dim), jnp.float32),
        reactant_embedding=jax.random.normal(ks[3], (2, dim), jnp.float32),
        segment_embedding=jax.random.normal(ks[4], (30, dim), jnp.float32),
        pe=make_positional_encoding(max_len, dim),
        time_mlp=init_mlp_params(ks[5], dim),
        mlp=init_mlp_params(ks[6], dim),
    )


def sinusoidal_embedding(timesteps, dim, max_period=10000.0):
    timesteps = jnp.atleast_1d(timesteps).astype(jnp.float32)
    half = dim // 2
    freqs = jnp.exp(-math.log(max_period)
                    * jnp.arange(half, dtype=jnp.float32) / half)
    args = timesteps[:, None] * freqs[None, :]
    emb = jnp.concatenate([jnp.cos(args), jnp.sin(args)], axis=-1)
    if dim % 2 == 1:
        emb = jnp.concatenate([emb, jnp.zeros_like(emb[:, :1])], axis=-1)
    return emb  # [b, dim]


# ----------------------------------------------------------------------------
# Forward pass: gathers / time MLP / adjacency scatter in JAX, hot path Pallas.
# ----------------------------------------------------------------------------
def atom_encoder_forward(params, element, bond, aroma, charge, segment,
                         flag=None, time=None):
    b, l = element.shape
    dim = params["element_embedding"].shape[1]
    assert l <= params["pe"].shape[0], "sequence length exceeds positional max_len"
    # TODO(synk): production D should be a multiple of 128 (lane-dense); the
    # module's dim is taken as-is here.

    # Pre-summed additive embedding terms, batch-major [b, l, d] (XLA fuses).
    emb = params["element_embedding"][element]
    emb = emb + params["pe"][:l][None, :, :]
    # TODO(synk): positional-encoding and MLP nn.Dropout are eval-mode identity.
    emb = emb + params["aroma_embedding"][aroma.astype(jnp.int32)]
    emb = emb + params["charge_embedding"][charge + 6]
    emb = emb + params["segment_embedding"][segment]
    if flag is not None:
        emb = emb + params["reactant_embedding"][flag]
    if time is not None:
        # TimeEmbedding MLP hoisted out of the kernel: one batched [b, d] chain.
        sin_emb = sinusoidal_embedding(time, dim)
        time_e = _mlp_apply(sin_emb, *_mlp_args(params["time_mlp"]))   # [b, d]
        emb = emb + time_e[:, None, :]
    emb = emb.astype(jnp.float32)

    # Bond adjacency [b, l, l]: scatter-add of bond indices (same counts as the
    # torch eye/index_select+sum), then zero the diagonal (drops self/pad bonds
    # that use the self-index convention, exactly like the reference).
    if bond.shape[-1] == MAX_BONDS:
        bi = jnp.arange(b, dtype=jnp.int32)[:, None, None]
        ri = jnp.arange(l, dtype=jnp.int32)[None, :, None]
        adj = jnp.zeros((b, l, l), jnp.float32).at[bi, ri, bond].add(1.0)
    else:
        adj = bond.astype(jnp.float32)
    adj = adj * (1.0 - jnp.eye(l, dtype=jnp.float32))[None, :, :]
    adj = adj.astype(jnp.bfloat16)   # small integer counts: exact in bf16

    out_bld = pallas_atom_encoder_core(emb, adj, params["mlp"])
    # Module returns [l, b, dim]; downstream consumers should prefer the
    # batch-major [b, l, dim] result above to avoid this extra HBM round trip.
    return jnp.transpose(out_bld, (1, 0, 2))


# ----------------------------------------------------------------------------
if __name__ == "__main__":
    key = jax.random.PRNGKey(0)
    ntoken, dim = 20, 32
    b, l = 2, 8

    pkey, dkey = jax.random.split(key)
    params = init_atom_encoder_params(pkey, ntoken, dim)

    k1, k2, k3, k4, k5, k6, k7 = jax.random.split(dkey, 7)
    element = jax.random.randint(k1, (b, l), 0, ntoken)
    bond = jax.random.randint(k2, (b, l, MAX_BONDS), 0, l)
    aroma = jax.random.randint(k3, (b, l), 0, 2)
    charge = jax.random.randint(k4, (b, l), -2, 3)   # +2..-2, shifted by +6 inside
    segment = jax.random.randint(k5, (b, l), 0, 30)
    flag = jax.random.randint(k6, (b, l), 0, 2)
    time = jax.random.uniform(k7, (b,), jnp.float32, 0.0, 1000.0)

    fwd = jax.jit(atom_encoder_forward)
    out = fwd(params, element, bond, aroma, charge, segment, flag=flag, time=time)
    out = jax.block_until_ready(out)
    assert out.shape == (l, b, dim), out.shape
    assert out.dtype == jnp.float32
    assert bool(jnp.all(jnp.isfinite(out)))
    print("KERNEL_OK")
</pallas_src>

<mosaic_0001>
module attributes {stable_mosaic.version = 11 : i64} {
  func.func private @main(%arg0: i32) attributes {dimension_semantics = [#tpu.dimension_semantics<core_parallel>], iteration_bounds = array<i64: 2>, tpu.core_type = #tpu.core_type<sc_scalar_subcore>, window_params = []} {
    return
  }
}

module attributes {stable_mosaic.version = 11 : i64} {
  func.func private @main(%arg0: i32) attributes {dimension_semantics = [#tpu.dimension_semantics<core_parallel>], iteration_bounds = array<i64: 2>, tpu.core_type = #tpu.core_type<sc_scalar_subcore>, window_params = []} {
    return
  }
}

module attributes {stable_mosaic.version = 11 : i64} {
  func.func @kernel(%arg0: i32, %arg1: memref<1x8x32xf32, #tpu.memory_space<vmem>>, %arg2: memref<1x8x8xbf16, #tpu.memory_space<vmem>>, %arg3: memref<32x128xbf16, #tpu.memory_space<vmem>>, %arg4: memref<1x128xf32, #tpu.memory_space<vmem>>, %arg5: memref<128x32xbf16, #tpu.memory_space<vmem>>, %arg6: memref<1x32xf32, #tpu.memory_space<vmem>>, %arg7: memref<32x128xbf16, #tpu.memory_space<vmem>>, %arg8: memref<1x128xf32, #tpu.memory_space<vmem>>, %arg9: memref<128x32xbf16, #tpu.memory_space<vmem>>, %arg10: memref<1x32xf32, #tpu.memory_space<vmem>>, %arg11: memref<32x32xbf16, #tpu.memory_space<vmem>>, %arg12: memref<1x32xf32, #tpu.memory_space<vmem>>, %arg13: memref<1x8x32xf32, #tpu.memory_space<vmem>>) attributes {dimension_semantics = [#tpu.dimension_semantics<parallel>], iteration_bounds = array<i64: 2>, scalar_prefetch = 0 : i64, scratch_operands = 0 : i64, tpu.core_type = #tpu.core_type<tc>, window_params = [{transform_indices = @transform_0, window_bounds = array<i64: 1, 8, 32>}, {transform_indices = @transform_1, window_bounds = array<i64: 1, 8, 8>}, {pipeline_mode = #tpu.pipeline_mode<synchronous>, transform_indices = @transform_2, window_bounds = array<i64: 32, 128>}, {pipeline_mode = #tpu.pipeline_mode<synchronous>, transform_indices = @transform_3, window_bounds = array<i64: 1, 128>}, {pipeline_mode = #tpu.pipeline_mode<synchronous>, transform_indices = @transform_4, window_bounds = array<i64: 128, 32>}, {pipeline_mode = #tpu.pipeline_mode<synchronous>, transform_indices = @transform_5, window_bounds = array<i64: 1, 32>}, {pipeline_mode = #tpu.pipeline_mode<synchronous>, transform_indices = @transform_6, window_bounds = array<i64: 32, 128>}, {pipeline_mode = #tpu.pipeline_mode<synchronous>, transform_indices = @transform_7, window_bounds = array<i64: 1, 128>}, {pipeline_mode = #tpu.pipeline_mode<synchronous>, transform_indices = @transform_8, window_bounds = array<i64: 128, 32>}, {pipeline_mode = #tpu.pipeline_mode<synchronous>, transform_indices = @transform_9, window_bounds = array<i64: 1, 32>}, {pipeline_mode = #tpu.pipeline_mode<synchronous>, transform_indices = @transform_10, window_bounds = array<i64: 32, 32>}, {pipeline_mode = #tpu.pipeline_mode<synchronous>, transform_indices = @transform_11, window_bounds = array<i64: 1, 32>}, {transform_indices = @transform_12, window_bounds = array<i64: 1, 8, 32>}]} {
    %c0 = arith.constant 0 : index
    %c0_0 = arith.constant 0 : index
    %c0_1 = arith.constant 0 : index
    %0 = vector.load %arg1[%c0, %c0_0, %c0_1] : memref<1x8x32xf32, #tpu.memory_space<vmem>>, vector<1x8x32xf32>
    %1 = vector.shape_cast %0 : vector<1x8x32xf32> to vector<8x32xf32>
    %c0_2 = arith.constant 0 : index
    %c0_3 = arith.constant 0 : index
    %2 = vector.load %arg3[%c0_2, %c0_3] : memref<32x128xbf16, #tpu.memory_space<vmem>>, vector<32x128xbf16>
    %c0_4 = arith.constant 0 : index
    %c0_5 = arith.constant 0 : index
    %3 = vector.load %arg4[%c0_4, %c0_5] : memref<1x128xf32, #tpu.memory_space<vmem>>, vector<1x128xf32>
    %c0_6 = arith.constant 0 : index
    %c0_7 = arith.constant 0 : index
    %4 = vector.load %arg5[%c0_6, %c0_7] : memref<128x32xbf16, #tpu.memory_space<vmem>>, vector<128x32xbf16>
    %c0_8 = arith.constant 0 : index
    %c0_9 = arith.constant 0 : index
    %5 = vector.load %arg6[%c0_8, %c0_9] : memref<1x32xf32, #tpu.memory_space<vmem>>, vector<1x32xf32>
    %c0_10 = arith.constant 0 : index
    %c0_11 = arith.constant 0 : index
    %6 = vector.load %arg7[%c0_10, %c0_11] : memref<32x128xbf16, #tpu.memory_space<vmem>>, vector<32x128xbf16>
    %c0_12 = arith.constant 0 : index
    %c0_13 = arith.constant 0 : index
    %7 = vector.load %arg8[%c0_12, %c0_13] : memref<1x128xf32, #tpu.memory_space<vmem>>, vector<1x128xf32>
    %c0_14 = arith.constant 0 : index
    %c0_15 = arith.constant 0 : index
    %8 = vector.load %arg9[%c0_14, %c0_15] : memref<128x32xbf16, #tpu.memory_space<vmem>>, vector<128x32xbf16>
    %c0_16 = arith.constant 0 : index
    %c0_17 = arith.constant 0 : index
    %9 = vector.load %arg10[%c0_16, %c0_17] : memref<1x32xf32, #tpu.memory_space<vmem>>, vector<1x32xf32>
    %c0_18 = arith.constant 0 : index
    %c0_19 = arith.constant 0 : index
    %10 = vector.load %arg11[%c0_18, %c0_19] : memref<32x32xbf16, #tpu.memory_space<vmem>>, vector<32x32xbf16>
    %c0_20 = arith.constant 0 : index
    %c0_21 = arith.constant 0 : index
    %11 = vector.load %arg12[%c0_20, %c0_21] : memref<1x32xf32, #tpu.memory_space<vmem>>, vector<1x32xf32>
    %12 = arith.truncf %1 : vector<8x32xf32> to vector<8x32xbf16>
    %cst = arith.constant dense<0.000000e+00> : vector<8x128xf32>
    %13 = tpu.matmul %12, %2, %cst {dimension_numbers = #tpu.dot_dimension_numbers<[1], [0], [0], [1], [0, 0, 1, 1], [], []>} : vector<8x32xbf16>, vector<32x128xbf16>, vector<8x128xf32> -> vector<8x128xf32>
    %14 = vector.broadcast %3 : vector<1x128xf32> to vector<8x128xf32>
    %15 = arith.addf %13, %14 : vector<8x128xf32>
    %cst_22 = arith.constant 0.000000e+00 : f32
    %16 = vector.broadcast %cst_22 : f32 to vector<8x128xf32>
    %17 = arith.maximumf %15, %16 : vector<8x128xf32>
    %18 = arith.truncf %17 : vector<8x128xf32> to vector<8x128xbf16>
    %cst_23 = arith.constant dense<0.000000e+00> : vector<8x32xf32>
    %19 = tpu.matmul %18, %4, %cst_23 {dimension_numbers = #tpu.dot_dimension_numbers<[1], [0], [0], [1], [0, 0, 1, 1], [], []>} : vector<8x128xbf16>, vector<128x32xbf16>, vector<8x32xf32> -> vector<8x32xf32>
    %20 = arith.addf %1, %19 : vector<8x32xf32>
    %21 = vector.broadcast %5 : vector<1x32xf32> to vector<8x32xf32>
    %22 = arith.addf %20, %21 : vector<8x32xf32>
    %23 = arith.truncf %22 : vector<8x32xf32> to vector<8x32xbf16>
    %cst_24 = arith.constant dense<0.000000e+00> : vector<8x128xf32>
    %24 = tpu.matmul %23, %6, %cst_24 {dimension_numbers = #tpu.dot_dimension_numbers<[1], [0], [0], [1], [0, 0, 1, 1], [], []>} : vector<8x32xbf16>, vector<32x128xbf16>, vector<8x128xf32> -> vector<8x128xf32>
    %25 = vector.broadcast %7 : vector<1x128xf32> to vector<8x128xf32>
    %26 = arith.addf %24, %25 : vector<8x128xf32>
    %cst_25 = arith.constant 0.000000e+00 : f32
    %27 = vector.broadcast %cst_25 : f32 to vector<8x128xf32>
    %28 = arith.maximumf %26, %27 : vector<8x128xf32>
    %29 = arith.truncf %28 : vector<8x128xf32> to vector<8x128xbf16>
    %cst_26 = arith.constant dense<0.000000e+00> : vector<8x32xf32>
    %30 = tpu.matmul %29, %8, %cst_26 {dimension_numbers = #tpu.dot_dimension_numbers<[1], [0], [0], [1], [0, 0, 1, 1], [], []>} : vector<8x128xbf16>, vector<128x32xbf16>, vector<8x32xf32> -> vector<8x32xf32>
    %31 = arith.addf %22, %30 : vector<8x32xf32>
    %32 = vector.broadcast %9 : vector<1x32xf32> to vector<8x32xf32>
    %33 = arith.addf %31, %32 : vector<8x32xf32>
    %34 = arith.truncf %33 : vector<8x32xf32> to vector<8x32xbf16>
    %cst_27 = arith.constant dense<0.000000e+00> : vector<8x32xf32>
    %35 = tpu.matmul %34, %10, %cst_27 {dimension_numbers = #tpu.dot_dimension_numbers<[1], [0], [0], [1], [0, 0, 1, 1], [], []>} : vector<8x32xbf16>, vector<32x32xbf16>, vector<8x32xf32> -> vector<8x32xf32>
    %36 = vector.broadcast %11 : vector<1x32xf32> to vector<8x32xf32>
    %37 = arith.addf %35, %36 : vector<8x32xf32>
    %c0_28 = arith.constant 0 : index
    %c0_29 = arith.constant 0 : index
    %c0_30 = arith.constant 0 : index
    %38 = vector.load %arg2[%c0_28, %c0_29, %c0_30] : memref<1x8x8xbf16, #tpu.memory_space<vmem>>, vector<1x8x8xbf16>
    %39 = arith.truncf %37 : vector<8x32xf32> to vector<8x32xbf16>
    %40 = vector.shape_cast %39 : vector<8x32xbf16> to vector<1x8x32xbf16>
    "tpu.trace_start"() <{level = 10 : i32, message = "bkl,bld->bkd"}> : () -> ()
    %cst_31 = arith.constant dense<0.000000e+00> : vector<1x8x32xf32>
    %41 = tpu.matmul %38, %40, %cst_31 {dimension_numbers = #tpu.dot_dimension_numbers<[2], [1], [1], [2], [0, 0, 0, 1, 1, 2], [0], [0]>} : vector<1x8x8xbf16>, vector<1x8x32xbf16>, vector<1x8x32xf32> -> vector<1x8x32xf32>
    "tpu.trace_stop"() : () -> ()
    %42 = arith.addf %0, %41 : vector<1x8x32xf32>
    %c0_32 = arith.constant 0 : index
    %c0_33 = arith.constant 0 : index
    %c0_34 = arith.constant 0 : index
    %43 = vector.load %arg13[%c0_32, %c0_33, %c0_34] : memref<1x8x32xf32, #tpu.memory_space<vmem>>, vector<1x8x32xf32>
    tpu.vector_store %arg13[%c0_32, %c0_33, %c0_34], %42 {strides = array<i32>} : memref<1x8x32xf32, #tpu.memory_space<vmem>>, vector<1x8x32xf32>,
    return
  }
  func.func @transform_0(%arg0: i32) -> (i32, i32, i32) {
    %c0_i32 = arith.constant 0 : i32
    %c0_i32_0 = arith.constant 0 : i32
    %c0_i32_1 = arith.constant 0 : i32
    return %arg0, %c0_i32, %c0_i32_0 : i32, i32, i32
  }
  func.func @transform_1(%arg0: i32) -> (i32, i32, i32) {
    %c0_i32 = arith.constant 0 : i32
    %c0_i32_0 = arith.constant 0 : i32
    %c0_i32_1 = arith.constant 0 : i32
    return %arg0, %c0_i32, %c0_i32_0 : i32, i32, i32
  }
  func.func @transform_2(%arg0: i32) -> (i32, i32) {
    %c0_i32 = arith.constant 0 : i32
    %c0_i32_0 = arith.constant 0 : i32
    %c0_i32_1 = arith.constant 0 : i32
    return %c0_i32, %c0_i32_0 : i32, i32
  }
  func.func @transform_3(%arg0: i32) -> (i32, i32) {
    %c0_i32 = arith.constant 0 : i32
    %c0_i32_0 = arith.constant 0 : i32
    %c0_i32_1 = arith.constant 0 : i32
    return %c0_i32, %c0_i32_0 : i32, i32
  }
  func.func @transform_4(%arg0: i32) -> (i32, i32) {
    %c0_i32 = arith.constant 0 : i32
    %c0_i32_0 = arith.constant 0 : i32
    %c0_i32_1 = arith.constant 0 : i32
    return %c0_i32, %c0_i32_0 : i32, i32
  }
  func.func @transform_5(%arg0: i32) -> (i32, i32) {
    %c0_i32 = arith.constant 0 : i32
    %c0_i32_0 = arith.constant 0 : i32
    %c0_i32_1 = arith.constant 0 : i32
    return %c0_i32, %c0_i32_0 : i32, i32
  }
  func.func @transform_6(%arg0: i32) -> (i32, i32) {
    %c0_i32 = arith.constant 0 : i32
    %c0_i32_0 = arith.constant 0 : i32
    %c0_i32_1 = arith.constant 0 : i32
    return %c0_i32, %c0_i32_0 : i32, i32
  }
  func.func @transform_7(%arg0: i32) -> (i32, i32) {
    %c0_i32 = arith.constant 0 : i32
    %c0_i32_0 = arith.constant 0 : i32
    %c0_i32_1 = arith.constant 0 : i32
    return %c0_i32, %c0_i32_0 : i32, i32
  }
  func.func @transform_8(%arg0: i32) -> (i32, i32) {
    %c0_i32 = arith.constant 0 : i32
    %c0_i32_0 = arith.constant 0 : i32
    %c0_i32_1 = arith.constant 0 : i32
    return %c0_i32, %c0_i32_0 : i32, i32
  }
  func.func @transform_9(%arg0: i32) -> (i32, i32) {
    %c0_i32 = arith.constant 0 : i32
    %c0_i32_0 = arith.constant 0 : i32
    %c0_i32_1 = arith.constant 0 : i32
    return %c0_i32, %c0_i32_0 : i32, i32
  }
  func.func @transform_10(%arg0: i32) -> (i32, i32) {
    %c0_i32 = arith.constant 0 : i32
    %c0_i32_0 = arith.constant 0 : i32
    %c0_i32_1 = arith.constant 0 : i32
    return %c0_i32, %c0_i32_0 : i32, i32
  }
  func.func @transform_11(%arg0: i32) -> (i32, i32) {
    %c0_i32 = arith.constant 0 : i32
    %c0_i32_0 = arith.constant 0 : i32
    %c0_i32_1 = arith.constant 0 : i32
    return %c0_i32, %c0_i32_0 : i32, i32
  }
  func.func @transform_12(%arg0: i32) -> (i32, i32, i32) {
    %c0_i32 = arith.constant 0 : i32
    %c0_i32_0 = arith.constant 0 : i32
    %c0_i32_1 = arith.constant 0 : i32
    return %arg0, %c0_i32, %c0_i32_0 : i32, i32, i32
  }
}

</mosaic_0001>

<bundles_post_ra>
// kernel: atom_encoder_forward.1
= control target key start
LH: loop header
LB: loop body
LE: loop exit
PB: predicated region body
PF: predicated region fallthrough
CT: control target
= control target key end

     0   :  { %s1224_s21 = smov 0   ;;  %s1378_s0 = inlined_call_operand.vmem [shape: f32[2,8,32], index: 0, kind: input, shape index: {}]   ;;  %s1379_s1 = inlined_call_operand.vmem [shape: bf16[2,8,8], index: 1, kind: input, shape index: {}]   ;;  %s1380_s2 = inlined_call_operand.vmem [shape: bf16[32,128], index: 2, kind: input, shape index: {}]   ;;  %s1381_s3 = inlined_call_operand.vmem [shape: f32[1,128], index: 3, kind: input, shape index: {}]   ;;  %s1382_s4 = inlined_call_operand.vmem [shape: bf16[128,32], index: 4, kind: input, shape index: {}]   ;;  %s1383_s5 = inlined_call_operand.vmem [shape: f32[1,32], index: 5, kind: input, shape index: {}]   ;;  %s1384_s6 = inlined_call_operand.vmem [shape: bf16[32,128], index: 6, kind: input, shape index: {}]   ;;  %s1385_s7 = inlined_call_operand.vmem [shape: f32[1,128], index: 7, kind: input, shape index: {}]   ;;  %s1386_s8 = inlined_call_operand.vmem [shape: bf16[128,32], index: 8, kind: input, shape index: {}]   ;;  %s1387_s9 = inlined_call_operand.vmem [shape: f32[1,32], index: 9, kind: input, shape index: {}]   ;;  %s1388_s10 = inlined_call_operand.vmem [shape: bf16[32,32], index: 10, kind: input, shape index: {}]   ;;  %s1389_s11 = inlined_call_operand.vmem [shape: f32[1,32], index: 11, kind: input, shape index: {}]   ;;  %s1390_s12 = inlined_call_operand.vmem [shape: f32[2,8,32], index: 12, kind: output, shape index: {}]  }
   0x1 LB: > { %s977_s22 = sadd.s32 4294967295, %s1155_s21   ;;  %p981_p0 = scmp.ge.s32.totalorder %s1155_s21, 1  ;;  %s1155_s21 = sphi %s1224_s21, %s22_s21  }
   0x2   : > { %p370_p1 = scmp.lt.s32.totalorder %s1155_s21, 3 }
   0x4   : > { %p371_p2 = pnand %p981_p0, %p370_p1 }
   0x5   : > { %v1127_v0 = vld [vmem:[%s1380_s2] sm:$0xff] (!%p371_p2)   ;;  %v1157_v1 = vmov (!%p371_p2), 0.0   ;;  %v1128_v2 = vld [vmem:[%s1380_s2 + $0x8] sm:$0xff] (!%p371_p2)   ;;  %vm1158_vm0 = vmmov (!%p371_p2), 0   ;;  %p414_p3 = scmp.lt.s32.totalorder (!%p371_p2), %s977_s22, 1  ;;  %vm496_vm1 = vcmask (!%p371_p2), 261120  }
   0x6   : > { %374 = sbr.rel (%p371_p2) target bundleno = 1326 (0x52e), region = 68  ;;  %1047 = vmatprep.subr.bf16.mxu0 (!%p371_p2), %v1157_v1  ;;  %1055 = vmatprep.subr.bf16.mxu1 (!%p371_p2), %v1157_v1  ;;  %v1129_v3 = vld [vmem:[%s1382_s4] sm:$0xff] (!%p371_p2)   ;;  %v1130_v4 = vld [vmem:[%s1382_s4 + $0x8] sm:$0xff] (!%p371_p2)   ;;  %v1131_v6 = vld [vmem:[%s1382_s4 + $0x10] sm:$0xff] (!%p371_p2)   ;;  %vm866_vm2 = vcmask (!%p371_p2), 1043456   ;;  %vm862_vm3 = vcmask (!%p371_p2), 64512  }
   0x7   : > { %1048 = vmatpush3.bf16.msra.mxu0 (!%p371_p2), %v1127_v0  ;;  %1051 = vmatprep.mubr.msk.bf16.mxu0 (!%p371_p2), %vm1158_vm0, %v1157_v1  ;;  %v1132_v8 = vld [vmem:[%s1382_s4 + $0x18] sm:$0xff] (!%p371_p2)   ;;  %v1133_v9 = vld [vmem:[%s1382_s4 + $0x20] sm:$0xff] (!%p371_p2)   ;;  %v1134_v10 = vld [vmem:[%s1382_s4 + $0x28] sm:$0xff] (!%p371_p2)  }
   0x8   : > { %1049 = vmatprep.subr.bf16.mxu0 (!%p371_p2), %v1157_v1  ;;  %1071 = vmatprep.mubr.msk.bf16.mxu1 (!%p371_p2), %vm1158_vm0, %v1157_v1  ;;  %v1135_v11 = vld [vmem:[%s1382_s4 + $0x30] sm:$0xff] (!%p371_p2)   ;;  %v1136_v12 = vld [vmem:[%s1382_s4 + $0x38] sm:$0xff] (!%p371_p2)   ;;  %v985_v13 = vld [vmem:[%s1381_s3] ss:$0 sm:$0xff] (!%p371_p2) }
   0x9   : > { %1056 = vmatpush3.bf16.msra.mxu1 (!%p371_p2), %v1129_v3  ;;  %v1137_v21 = vld [vmem:[%s1384_s6] sm:$0xff] (!%p371_p2)   ;;  %v1138_v22 = vld [vmem:[%s1384_s6 + $0x8] sm:$0xff] (!%p371_p2)   ;;  %v1141_v33 = vld [vmem:[%s1386_s8 + $0x10] sm:$0xff] (!%p371_p2)  }
   0xa   : > { %1057 = vmatprep.subr.bf16.mxu1 (!%p371_p2), %v1157_v1  ;;  %v997_v23 = vld [vmem:[%s1383_s5] ss:$0 sm:$0xff] (!%p371_p2)  ;;  %v1140_v32 = vld [vmem:[%s1386_s8 + $0x8] sm:$0xff] (!%p371_p2)   ;;  %v1142_v34 = vld [vmem:[%s1386_s8 + $0x18] sm:$0xff] (!%p371_p2)  }
   0xb   : > { %1050 = vmatpush3.bf16.msra.mxu0 (!%p371_p2), %v1128_v2  ;;  %v1139_v30 = vld [vmem:[%s1386_s8] sm:$0xff] (!%p371_p2)   ;;  %v1144_v36 = vld [vmem:[%s1386_s8 + $0x28] sm:$0xff] (!%p371_p2)   ;;  %v1145_v37 = vld [vmem:[%s1386_s8 + $0x30] sm:$0xff] (!%p371_p2)  }
   0xc   : > { %1075 = vmatprep.subr.bf16.mxu0 (!%p371_p2), %v1157_v1  ;;  %v1143_v35 = vld [vmem:[%s1386_s8 + $0x20] sm:$0xff] (!%p371_p2)   ;;  %v1146_v38 = vld [vmem:[%s1386_s8 + $0x38] sm:$0xff] (!%p371_p2)   ;;  %v1148_v48 = vld [vmem:[%s1388_s10 + $0x8] sm:$0xff] (!%p371_p2)  }
   0xd   : > { %s1392_s22 = smov (!%p414_p3, %s977_s22), 1  ;;  %1058 = vmatpush3.bf16.msra.mxu1 %v1130_v4  ;;  %v998_v39 = vld [vmem:[%s1385_s7] ss:$0 sm:$0xff] }
   0xe   : > { %s982_s13 = sshll.u32 %s1392_s22, 3  ;;  %1059 = vmatprep.subr.bf16.mxu1 %v1157_v1  ;;  %v1147_v47 = vld [vmem:[%s1388_s10] sm:$0xff]   ;;  %s983_s18 = sshll.u32 %s1392_s22, 2 }
   0xf   : > { %s417_s16 = scalar_lea.vmem %s1378_s0, %s982_s13  ;;  %v1010_v49 = vld [vmem:[%s1387_s9] ss:$0 sm:$0xff]  ;;  %s421_s23 = scalar_lea.vmem %s1379_s1, %s983_s18 }
  0x10   : > { %v1261_v5 = vld [vmem:[%s417_s16] sm:$0xff]  ;;  %s425_s26 = scalar_lea.vmem %s1390_s12, %s982_s13 }
  0x11   : > { %v477_v7 = vpack.c.bf16 %v1261_v5, %v1261_v5  ;;  %1060 = vmatpush3.bf16.msra.mxu1 %v1131_v6  ;;  %v1011_v57 = vld [vmem:[%s1389_s11] ss:$0 sm:$0xff] }
  0x12   : > { %1061 = vmatprep.subr.bf16.mxu1 %v1157_v1 }
  0x13   : > { %1052 = vmatmul.mubr.msk.bf16.vlgmr.msra.gmra.mrb[0].mxu0 %vm496_vm1, %v477_v7 }
  0x14   : > { %1079 = vmatprep.mubr.msk.bf16.mxu0 %vm1158_vm0, %v1157_v1  ;;  %1076 = vmatpush3.bf16.msra.mxu0 %v1137_v21 }
  0x15   : > { %1062 = vmatpush3.bf16.msra.mxu1 %v1132_v8  ;;  %1077 = vmatprep.subr.bf16.mxu0 %v1157_v1 }
  0x16   : > { %1063 = vmatprep.subr.bf16.mxu1 %v1157_v1 }
  0x18   : > { %1078 = vmatpush3.bf16.msra.mxu0 %v1138_v22 }
  0x19   : > { %1064 = vmatpush3.bf16.msra.mxu1 %v1133_v9  ;;  %1083 = vmatprep.subr.bf16.mxu0 %v1157_v1 }
  0x1a   : > { %1065 = vmatprep.subr.bf16.mxu1 %v1157_v1 }
  0x1d   : > { %1066 = vmatpush3.bf16.msra.mxu1 %v1134_v10 }
  0x1e   : > { %1067 = vmatprep.subr.bf16.mxu1 %v1157_v1 }
  0x21   : > { %1068 = vmatpush3.bf16.msra.mxu1 %v1135_v11 }
  0x22   : > { %1069 = vmatprep.subr.bf16.mxu1 %v1157_v1 }
  0x25   : > { %1070 = vmatpush3.bf16.msra.mxu1 %v1136_v12 }
  0x26   : > { %1103 = vmatprep.subr.bf16.mxu1 %v1157_v1 }
  0xe6   : > { %v534_v14 = vpop.f32.mrb[0].mxu0 }
  0xe7   : > { %v535_v15 = vadd.f32 %v985_v13, %v534_v14  ;;  %v1053_v16 = vpop.f32.mrb[1].mxu0 }
  0xe8   : > { %v537_v17 = vpop.f32.mrb[2].mxu0 }
  0xe9   : > { %v540_v18 = vmax.f32 %v535_v15, 0.0  ;;  %v1054_v19 = vpop.f32.mrb[3].mxu0 }
  0xeb   : > { %v541_v20 = vpack.c.bf16 %v540_v18, %v540_v18 }
  0xed   : > { %1072 = vmatmul.mubr.bf16.vlgmr.msra.gmra.mrb[0].mxu1 %v541_v20 }
  0xee   : > { %1107 = vmatprep.mubr.msk.bf16.mxu1 %vm1158_vm0, %v1157_v1  ;;  %1104 = vmatpush3.bf16.msra.mxu1 %v1147_v47 }
  0xef   : > { %1105 = vmatprep.subr.bf16.mxu1 %v1157_v1 }
  0xf2   : > { %1106 = vmatpush3.bf16.msra.mxu1 %v1148_v48 }
  0xf3   : > { %1111 = vmatprep.subr.bf16.mxu1 %v1157_v1 }
 0x1c0   : > { %v624_v24 = vpop.f32.mrb[0].mxu1 }
 0x1c1   : > { %v630_v25 = vadd.f32 %v624_v24, %v1261_v5  ;;  %v1073_v26 = vpop.f32.mrb[1].mxu1 }
 0x1c2   : > { %v627_v27 = vpop.f32.mrb[2].mxu1 }
 0x1c3   : > { %v637_v28 = vadd.f32 %v997_v23, %v630_v25  ;;  %v1074_v29 = vpop.f32.mrb[3].mxu1 }
 0x1c5   : > { %v638_v31 = vpack.c.bf16 %v637_v28, %v637_v28 }
 0x1c7   : > { %1080 = vmatmul.mubr.msk.bf16.vlgmr.msra.gmra.mrb[4].mxu0 %vm496_vm1, %v638_v31 }
 0x1c8   : > { %1084 = vmatpush3.bf16.msra.mxu0 %v1139_v30  ;;  %1099 = vmatprep.mubr.msk.bf16.mxu0 %vm1158_vm0, %v1157_v1 }
 0x1c9   : > { %1085 = vmatprep.subr.bf16.mxu0 %v1157_v1 }
 0x1cc   : > { %1086 = vmatpush3.bf16.msra.mxu0 %v1140_v32 }
 0x1cd   : > { %1087 = vmatprep.subr.bf16.mxu0 %v1157_v1 }
 0x1d0   : > { %1088 = vmatpush3.bf16.msra.mxu0 %v1141_v33 }
 0x1d1   : > { %1089 = vmatprep.subr.bf16.mxu0 %v1157_v1 }
 0x1d4   : > { %1090 = vmatpush3.bf16.msra.mxu0 %v1142_v34 }
 0x1d5   : > { %1091 = vmatprep.subr.bf16.mxu0 %v1157_v1 }
 0x1d8   : > { %1092 = vmatpush3.bf16.msra.mxu0 %v1143_v35 }
 0x1d9   : > { %1093 = vmatprep.subr.bf16.mxu0 %v1157_v1 }
 0x1dc   : > { %1094 = vmatpush3.bf16.msra.mxu0 %v1144_v36 }
 0x1dd   : > { %1095 = vmatprep.subr.bf16.mxu0 %v1157_v1 }
 0x1e0   : > { %1096 = vmatpush3.bf16.msra.mxu0 %v1145_v37 }
 0x1e1   : > { %1097 = vmatprep.subr.bf16.mxu0 %v1157_v1 }
 0x1e4   : > { %1098 = vmatpush3.bf16.msra.mxu0 %v1146_v38 }
 0x29a   : > { %v694_v40 = vpop.f32.mrb[4].mxu0 }
 0x29b   : > { %v695_v41 = vadd.f32 %v998_v39, %v694_v40  ;;  %v1081_v42 = vpop.f32.mrb[5].mxu0 }
 0x29c   : > { %v697_v43 = vpop.f32.mrb[6].mxu0 }
 0x29d   : > { %v700_v44 = vmax.f32 %v695_v41, 0.0  ;;  %v1082_v45 = vpop.f32.mrb[7].mxu0 }
 0x29f   : > { %v701_v46 = vpack.c.bf16 %v700_v44, %v700_v44 }
 0x2a1   : > { %1100 = vmatmul.mubr.bf16.vlgmr.msra.gmra.mrb[8].mxu0 %v701_v46 }
 0x374   : > { %v784_v50 = vpop.f32.mrb[8].mxu0 }
 0x375   : > { %v790_v51 = vadd.f32 %v784_v50, %v637_v28  ;;  %v1101_v52 = vpop.f32.mrb[9].mxu0 }
 0x376   : > { %v787_v53 = vpop.f32.mrb[10].mxu0 }
 0x377   : > { %v797_v54 = vadd.f32 %v1010_v49, %v790_v51  ;;  %v1102_v55 = vpop.f32.mrb[11].mxu0 }
 0x379   : > { %v798_v56 = vpack.c.bf16 %v797_v54, %v797_v54 }
 0x37b   : > { %1108 = vmatmul.mubr.msk.bf16.vlgmr.msra.gmra.mrb[4].mxu1 %vm496_vm1, %v798_v56 }
 0x37c   : > { %1113 = vmatprep.mubr.msk.bf16.mxu1 %vm1158_vm0, %v1157_v1  ;;  %v860_v1 = vld [vmem:[%s421_s23] sm:$0xf] }
 0x44e   : > { %v854_v58 = vpop.f32.mrb[4].mxu1 }
 0x44f   : > { %v855_v59 = vadd.f32 %v1011_v57, %v854_v58  ;;  %v1109_v60 = vpop.f32.mrb[5].mxu1 }
 0x450   : > { %v857_v61 = vpop.f32.mrb[6].mxu1 }
 0x451   : > { %v861_v62 = vpack.c.bf16 %v855_v59, %v855_v59  ;;  %v1110_v63 = vpop.f32.mrb[7].mxu1 }
 0x453   : > { %v868_v0 = vsel %vm866_vm2, %v861_v62, 0 }
 0x454   : > { %1112 = vmatpush3.bf16.msra.mxu1 %v868_v0 }
 0x457   : > { %1114 = vmatmul.mubr.msk.bf16.vlgmr.msra.gmra.mrb[8].mxu1 %vm862_vm3, %v860_v1 }
 0x52a   : > { %v904_v2 = vpop.f32.mrb[8].mxu1 }
 0x52b   : > { %v910_v3 = vadd.f32 %v904_v2, %v1261_v5  ;;  %v1115_v4 = vpop.f32.mrb[9].mxu1 }
 0x52c   : > { %v907_v6 = vpop.f32.mrb[10].mxu1 }
 0x52d   : > { %911 = vst.msk [vmem:[%s425_s26] sm:$0xff] %vm496_vm1, %v910_v3  ;;  %v1116_v7 = vpop.f32.mrb[11].mxu1 }
 0x52e PF: > { %s22_s21 = sadd.s32 1, %s1155_s21  }
 0x52f   : > { %p19_p4 = scmp.ge.s32.totalorder %s22_s21, 4  }
 0x531   :  { %21 = sbr.rel (!%p19_p4) target bundleno = 1 (0x1), region = 101 }

</bundles_post_ra>
